<compile_context>
chip_gen: v6e
topology: v6e:2x2x1
jax: 0.10.0
libtpu: 0.0.40
codegen_flags: <defaults>
</compile_context>

<pallas_src>
import jax
import jax.numpy as jnp
from jax.experimental import pallas as pl
from jax.experimental.pallas import tpu as pltpu


def self_attention_kernel(x_ref, w1_ref, b1_ref, w2_ref, b2_ref,
                          ctx_ref, wts_ref):
    """One batch element per grid step.

    x_ref  : [1, S, H]   encoder outputs for this batch element
    w1_ref : [H, U]      first projection weight (stored [in, out])
    b1_ref : [1, U]      first projection bias
    w2_ref : [1, U]      second projection weight (output width 1)
    b2_ref : [1, 1]      second projection bias
    ctx_ref: [1, 1, H]   context vector output
    wts_ref: [1, S, 1]   attention weights output
    """
    x = x_ref[0]                                   # [S, H], native dtype

    # ---- projection: Linear(H, U) -> ReLU  (MXU matmul, f32 accumulation) ----
    h = jnp.dot(x, w1_ref[...], preferred_element_type=jnp.float32)   # [S, U]
    h = jnp.maximum(h + b1_ref[...].astype(jnp.float32), 0.0)

    # ---- projection: Linear(U, 1)  as mul + lane-reduce (keeps MXU free) ----
    e = jnp.sum(h * w2_ref[...].astype(jnp.float32), axis=-1, keepdims=True)
    e = e + b2_ref[...].astype(jnp.float32)                            # [S, 1]

    # ---- softmax over the sequence axis ----
    e = e - jnp.max(e, axis=0, keepdims=True)
    p = jnp.exp(e)
    w = p / jnp.sum(p, axis=0, keepdims=True)                          # [S, 1]

    # ---- weighted sum over sequence -> context vector ----
    xf = x.astype(jnp.float32)
    ctx = jnp.sum(xf * w, axis=0, keepdims=True)                       # [1, H]

    ctx_ref[0] = ctx.astype(ctx_ref.dtype)
    wts_ref[0] = w.astype(wts_ref.dtype)


def self_attention(encoder_outputs, w1, b1, w2, b2):
    """encoder_outputs: [B, S, H]; w1: [H, U]; b1: [U]; w2: [U]; b2: scalar.

    Returns (context_vector [B, H], weights [B, S]) — same as the PyTorch
    module's forward.
    """
    B, S, H = encoder_outputs.shape
    U = w1.shape[1]

    b1_r = b1.reshape(1, U)
    w2_r = w2.reshape(1, U)
    b2_r = jnp.reshape(b2, (1, 1))

    ctx3, wts3 = pl.pallas_call(
        self_attention_kernel,
        out_shape=(
            jax.ShapeDtypeStruct((B, 1, H), encoder_outputs.dtype),
            jax.ShapeDtypeStruct((B, S, 1), encoder_outputs.dtype),
        ),
        grid_spec=pltpu.PrefetchScalarGridSpec(
            num_scalar_prefetch=0,
            grid=(B,),
            in_specs=[
                pl.BlockSpec((1, S, H), lambda b: (b, 0, 0)),   # x: per-batch tile
                pl.BlockSpec((H, U),    lambda b: (0, 0)),      # W1: VMEM-resident
                pl.BlockSpec((1, U),    lambda b: (0, 0)),      # b1
                pl.BlockSpec((1, U),    lambda b: (0, 0)),      # W2 (row)
                pl.BlockSpec((1, 1),    lambda b: (0, 0)),      # b2
            ],
            out_specs=[
                pl.BlockSpec((1, 1, H), lambda b: (b, 0, 0)),
                pl.BlockSpec((1, S, 1), lambda b: (b, 0, 0)),
            ],
        ),
        compiler_params=pltpu.CompilerParams(
            dimension_semantics=("parallel",)),
    )(encoder_outputs, w1, b1_r, w2_r, b2_r)

    return ctx3.reshape(B, H), wts3.reshape(B, S)


def self_attention_ref(x, w1, b1, w2, b2):
    """Pure-JAX reference matching the PyTorch forward."""
    h = jax.nn.relu(jnp.einsum("bsh,hu->bsu", x, w1) + b1)
    e = jnp.einsum("bsu,u->bs", h, w2) + b2
    wts = jax.nn.softmax(e, axis=1)
    ctx = jnp.einsum("bs,bsh->bh", wts, x)
    return ctx, wts


if __name__ == "__main__":
    # hidden_dim = 64 (e.g. bi-directional utterance encoder), args.utter_hidden = 32
    B, S, H, U = 2, 8, 64, 32

    key = jax.random.PRNGKey(0)
    k0, k1, k2, k3, k4 = jax.random.split(key, 5)

    encoder_outputs = jax.random.normal(k0, (B, S, H), dtype=jnp.float32)
    W1 = jax.random.normal(k1, (H, U), dtype=jnp.float32) * 0.1   # [in, out]
    b1 = jax.random.normal(k2, (U,), dtype=jnp.float32) * 0.1
    W2 = jax.random.normal(k3, (U,), dtype=jnp.float32) * 0.1
    b2 = jax.random.normal(k4, (), dtype=jnp.float32) * 0.1

    ctx, wts = self_attention(encoder_outputs, W1, b1, W2, b2)
    ctx, wts = jax.block_until_ready((ctx, wts))

    ctx_ref, wts_ref = self_attention_ref(encoder_outputs, W1, b1, W2, b2)

    assert ctx.shape == (B, H) and wts.shape == (B, S)
    assert jnp.allclose(wts, wts_ref, atol=1e-4, rtol=1e-4), "weights mismatch"
    assert jnp.allclose(ctx, ctx_ref, atol=1e-4, rtol=1e-4), "context mismatch"

    print("KERNEL_OK")
</pallas_src>

<mosaic_0001>
module attributes {stable_mosaic.version = 11 : i64} {
  func.func @self_attention_kernel(%arg0: i32, %arg1: memref<1x8x64xf32, #tpu.memory_space<vmem>>, %arg2: memref<64x32xf32, #tpu.memory_space<vmem>>, %arg3: memref<1x32xf32, #tpu.memory_space<vmem>>, %arg4: memref<1x32xf32, #tpu.memory_space<vmem>>, %arg5: memref<1x1xf32, #tpu.memory_space<vmem>>, %arg6: memref<1x1x64xf32, #tpu.memory_space<vmem>>, %arg7: memref<1x8x1xf32, #tpu.memory_space<vmem>>) attributes {dimension_semantics = [#tpu.dimension_semantics<parallel>], iteration_bounds = array<i64: 2>, scalar_prefetch = 0 : i64, scratch_operands = 0 : i64, tpu.core_type = #tpu.core_type<tc>, window_params = [{transform_indices = @transform_0, window_bounds = array<i64: 1, 8, 64>}, {pipeline_mode = #tpu.pipeline_mode<synchronous>, transform_indices = @transform_1, window_bounds = array<i64: 64, 32>}, {pipeline_mode = #tpu.pipeline_mode<synchronous>, transform_indices = @transform_2, window_bounds = array<i64: 1, 32>}, {pipeline_mode = #tpu.pipeline_mode<synchronous>, transform_indices = @transform_3, window_bounds = array<i64: 1, 32>}, {pipeline_mode = #tpu.pipeline_mode<synchronous>, transform_indices = @transform_4, window_bounds = array<i64: 1, 1>}, {transform_indices = @transform_5, window_bounds = array<i64: 1, 1, 64>}, {transform_indices = @transform_6, window_bounds = array<i64: 1, 8, 1>}]} {
    %c0 = arith.constant 0 : index
    %c0_0 = arith.constant 0 : index
    %c0_1 = arith.constant 0 : index
    %0 = vector.load %arg1[%c0, %c0_0, %c0_1] : memref<1x8x64xf32, #tpu.memory_space<vmem>>, vector<1x8x64xf32>
    %1 = vector.shape_cast %0 : vector<1x8x64xf32> to vector<8x64xf32>
    %c0_2 = arith.constant 0 : index
    %c0_3 = arith.constant 0 : index
    %2 = vector.load %arg2[%c0_2, %c0_3] : memref<64x32xf32, #tpu.memory_space<vmem>>, vector<64x32xf32>
    %cst = arith.constant dense<0.000000e+00> : vector<8x32xf32>
    %3 = tpu.matmul %1, %2, %cst {dimension_numbers = #tpu.dot_dimension_numbers<[1], [0], [0], [1], [0, 0, 1, 1], [], []>} : vector<8x64xf32>, vector<64x32xf32>, vector<8x32xf32> -> vector<8x32xf32>
    %c0_4 = arith.constant 0 : index
    %c0_5 = arith.constant 0 : index
    %4 = vector.load %arg3[%c0_4, %c0_5] : memref<1x32xf32, #tpu.memory_space<vmem>>, vector<1x32xf32>
    %5 = vector.broadcast %4 : vector<1x32xf32> to vector<8x32xf32>
    %6 = arith.addf %3, %5 : vector<8x32xf32>
    %cst_6 = arith.constant 0.000000e+00 : f32
    %7 = vector.broadcast %cst_6 : f32 to vector<8x32xf32>
    %8 = arith.maximumf %6, %7 : vector<8x32xf32>
    %c0_7 = arith.constant 0 : index
    %c0_8 = arith.constant 0 : index
    %9 = vector.load %arg4[%c0_7, %c0_8] : memref<1x32xf32, #tpu.memory_space<vmem>>, vector<1x32xf32>
    %10 = vector.broadcast %9 : vector<1x32xf32> to vector<8x32xf32>
    %11 = arith.mulf %8, %10 : vector<8x32xf32>
    %cst_9 = arith.constant dense<0.000000e+00> : vector<8xf32>
    %12 = vector.multi_reduction <add>, %11, %cst_9 [1] : vector<8x32xf32> to vector<8xf32>
    %13 = vector.shape_cast %12 : vector<8xf32> to vector<8x1xf32>
    %c0_10 = arith.constant 0 : index
    %c0_11 = arith.constant 0 : index
    %14 = vector.load %arg5[%c0_10, %c0_11] : memref<1x1xf32, #tpu.memory_space<vmem>>, vector<1x1xf32>
    %15 = vector.broadcast %14 : vector<1x1xf32> to vector<8x1xf32>
    %16 = arith.addf %13, %15 : vector<8x1xf32>
    %cst_12 = arith.constant dense<0xFF800000> : vector<1xf32>
    %17 = vector.multi_reduction <maximumf>, %16, %cst_12 [0] : vector<8x1xf32> to vector<1xf32>
    %18 = vector.shape_cast %17 : vector<1xf32> to vector<1x1xf32>
    %19 = vector.broadcast %18 : vector<1x1xf32> to vector<8x1xf32>
    %20 = arith.subf %16, %19 : vector<8x1xf32>
    %21 = math.exp %20 : vector<8x1xf32>
    %cst_13 = arith.constant dense<0.000000e+00> : vector<1xf32>
    %22 = vector.multi_reduction <add>, %21, %cst_13 [0] : vector<8x1xf32> to vector<1xf32>
    %23 = vector.shape_cast %22 : vector<1xf32> to vector<1x1xf32>
    %24 = vector.broadcast %23 : vector<1x1xf32> to vector<8x1xf32>
    %25 = arith.divf %21, %24 : vector<8x1xf32>
    %26 = vector.broadcast %25 : vector<8x1xf32> to vector<8x64xf32>
    %27 = arith.mulf %1, %26 : vector<8x64xf32>
    %cst_14 = arith.constant dense<0.000000e+00> : vector<64xf32>
    %28 = vector.multi_reduction <add>, %27, %cst_14 [0] : vector<8x64xf32> to vector<64xf32>
    %29 = vector.shape_cast %28 : vector<64xf32> to vector<1x64xf32>
    %c0_15 = arith.constant 0 : index
    %c0_16 = arith.constant 0 : index
    %c0_17 = arith.constant 0 : index
    %30 = vector.load %arg6[%c0_15, %c0_16, %c0_17] : memref<1x1x64xf32, #tpu.memory_space<vmem>>, vector<1x1x64xf32>
    %31 = vector.shape_cast %30 : vector<1x1x64xf32> to vector<1x64xf32>
    %32 = vector.shape_cast %29 : vector<1x64xf32> to vector<1x1x64xf32>
    tpu.vector_store %arg6[%c0_15, %c0_16, %c0_17], %32 {strides = array<i32>} : memref<1x1x64xf32, #tpu.memory_space<vmem>>, vector<1x1x64xf32>,
    %c0_18 = arith.constant 0 : index
    %c0_19 = arith.constant 0 : index
    %c0_20 = arith.constant 0 : index
    %33 = vector.load %arg7[%c0_18, %c0_19, %c0_20] : memref<1x8x1xf32, #tpu.memory_space<vmem>>, vector<1x8x1xf32>
    %34 = vector.shape_cast %33 : vector<1x8x1xf32> to vector<8x1xf32>
    %35 = vector.shape_cast %25 : vector<8x1xf32> to vector<1x8x1xf32>
    tpu.vector_store %arg7[%c0_18, %c0_19, %c0_20], %35 {strides = array<i32>} : memref<1x8x1xf32, #tpu.memory_space<vmem>>, vector<1x8x1xf32>,
    return
  }
  func.func @transform_0(%arg0: i32) -> (i32, i32, i32) {
    %c0_i32 = arith.constant 0 : i32
    %c0_i32_0 = arith.constant 0 : i32
    %c0_i32_1 = arith.constant 0 : i32
    return %arg0, %c0_i32, %c0_i32_0 : i32, i32, i32
  }
  func.func @transform_1(%arg0: i32) -> (i32, i32) {
    %c0_i32 = arith.constant 0 : i32
    %c0_i32_0 = arith.constant 0 : i32
    %c0_i32_1 = arith.constant 0 : i32
    return %c0_i32, %c0_i32_0 : i32, i32
  }
  func.func @transform_2(%arg0: i32) -> (i32, i32) {
    %c0_i32 = arith.constant 0 : i32
    %c0_i32_0 = arith.constant 0 : i32
    %c0_i32_1 = arith.constant 0 : i32
    return %c0_i32, %c0_i32_0 : i32, i32
  }
  func.func @transform_3(%arg0: i32) -> (i32, i32) {
    %c0_i32 = arith.constant 0 : i32
    %c0_i32_0 = arith.constant 0 : i32
    %c0_i32_1 = arith.constant 0 : i32
    return %c0_i32, %c0_i32_0 : i32, i32
  }
  func.func @transform_4(%arg0: i32) -> (i32, i32) {
    %c0_i32 = arith.constant 0 : i32
    %c0_i32_0 = arith.constant 0 : i32
    %c0_i32_1 = arith.constant 0 : i32
    return %c0_i32, %c0_i32_0 : i32, i32
  }
  func.func @transform_5(%arg0: i32) -> (i32, i32, i32) {
    %c0_i32 = arith.constant 0 : i32
    %c0_i32_0 = arith.constant 0 : i32
    %c0_i32_1 = arith.constant 0 : i32
    return %arg0, %c0_i32, %c0_i32_0 : i32, i32, i32
  }
  func.func @transform_6(%arg0: i32) -> (i32, i32, i32) {
    %c0_i32 = arith.constant 0 : i32
    %c0_i32_0 = arith.constant 0 : i32
    %c0_i32_1 = arith.constant 0 : i32
    return %arg0, %c0_i32, %c0_i32_0 : i32, i32, i32
  }
}

</mosaic_0001>

<bundles_post_ra>
// kernel: tpu_custom_call.1
= control target key start
LH: loop header
LB: loop body
LE: loop exit
PB: predicated region body
PF: predicated region fallthrough
CT: control target
= control target key end

     0   :  { %s829_s0 = inlined_call_operand.vmem [shape: f32[2,8,64], index: 0, kind: input, shape index: {}]   ;;  %s830_s1 = inlined_call_operand.vmem [shape: f32[64,32], index: 1, kind: input, shape index: {}]   ;;  %s831_s2 = inlined_call_operand.vmem [shape: f32[1,32], index: 2, kind: input, shape index: {}]   ;;  %s832_s3 = inlined_call_operand.vmem [shape: f32[1,32], index: 3, kind: input, shape index: {}]   ;;  %s833_s4 = inlined_call_operand.<no memory space> [shape: f32[1,1], index: 4, kind: input, shape index: {}]   ;;  %s834_s5 = inlined_call_operand.hbm [shape: f32[2,1,64], index: 5, kind: output, shape index: {0}]   ;;  %s835_s6 = inlined_call_operand.vmem [shape: f32[2,8,1], index: 6, kind: output, shape index: {1}]  }
   0x1   :  { %v12_v0 = vstv %s833_s4 }
   0x2   :  { %13 = vst [vmem:[#allocation2] sm:$0x1] %v12_v0 }
   0x3   :  { %14 = vsyncpa [#allocation4], 0 }
   0x4   :  { %16 = vsyncpa [#allocation4 + $0x1], 0  ;;  %s697_s23 = smov 0   ;;  %s699_s24 = smov 0  }
   0x5   :  { %s701_s25 = smov 0   ;;  %s703_s26 = smov 0  }
   0x6 LB: > { %s718_s4 = sadd.s32 4294967295, %s653_s26   ;;  %s505_s27 = sadd.s32 4294967294, %s653_s26   ;;  %s653_s26 = sphi %s703_s26, %s841_s26   ;;  %s649_s25 = sphi %s701_s25, %s840_s25   ;;  %s645_s24 = sphi %s699_s24, %s839_s24   ;;  %s641_s23 = sphi %s697_s23, %s838_s23  }
   0x7   : > { %s722_s28 = sadd.s32 1, %s653_s26   ;;  %s139_s29 = sadd.s32 1, %s649_s25 }
   0x8   : > { %s136_s30 = ssub.s32 %s653_s26, %s722_s28  ;;  %p149_p0 = scmp.ne.s32.totalorder %s649_s25, %s645_s24 }
   0x9   : > { %p137_p1 = scmp.eq.s32.totalorder %s136_s30, 0  ;;  %p150_p2 = scmp.eq.s32.totalorder %s718_s4, 1 }
   0xa   : > { %p155_p3 = scmp.ne.s32.totalorder %s645_s24, %s641_s23  ;;  %p156_p4 = scmp.eq.s32.totalorder %s505_s27, 1 }
   0xb   : > { %s733_s7 = scalar_select %p137_p1, %s649_s25, %s139_s29  }
   0xc   : > { %p735_p5 = por %p150_p2, %p149_p0  ;;  %p739_p6 = por %p156_p4, %p155_p3 }
   0xd   : > { %p508_p7 = scmp.ge.s32.totalorder %s653_s26, 1  ;;  %p219_p8 = scmp.lt.s32.totalorder %s653_s26, 3 }
   0xf   : > { %p220_p9 = pnand %p508_p7, %p219_p8 }
  0x10   : > { %p251_p10 = scmp.lt.s32.totalorder (!%p220_p9), %s718_s4, 1  ;;  %s243_s29 = sand.u32 (!%p220_p9), 1, %s645_s24  }
  0x11   : > { %223 = sbr.rel (%p220_p9) target bundleno = 591 (0x24f), region = 40  ;;  %s515_s30 = sshll.u32 (!%p220_p9), %s718_s4, 4 }
  0x12   : > { %s407_s13 = scalar_lea.sflag (!%p220_p9), [#allocation4], %s243_s29  ;;  %s658_s15 = smov (!%p220_p9), [#allocation3]  }
  0x13   : > { %s597_s17 = sshll.u32 (!%p220_p9), %s658_s15, 4  ;;  %s598_s17 = int_to_ptr.vmem [resolvable:$false] %s597_s17 }
  0x16   : > { %v267_v1 = vld [vmem:[%s830_s1 + $0x38] sm:$0xff]  ;;  %v655_v2 = vmov 0.0   ;;  %v266_v3 = vld [vmem:[%s830_s1 + $0x30] sm:$0xff]  ;;  %vm656_vm0 = vmmov 0   ;;  %v265_v4 = vld [vmem:[%s830_s1 + $0x28] sm:$0xff]  ;;  %s756_s16 = scalar_select %p251_p10, %s718_s4, 1 }
  0x17   : > { %527 = vmatprep.subr.mxu0 %v655_v2  ;;  %543 = vmatprep.mubr.msk.f32.mxu0 %vm656_vm0, %v655_v2  ;;  %v264_v5 = vld [vmem:[%s830_s1 + $0x20] sm:$0xff]  ;;  %v263_v6 = vld [vmem:[%s830_s1 + $0x18] sm:$0xff]  ;;  %v262_v7 = vld [vmem:[%s830_s1 + $0x10] sm:$0xff]  ;;  %vm275_vm1 = vcmask 523264   ;;  %vm358_vm2 = vcmask 261120   ;;  %v657_v19 = vmov 0  }
  0x18   : > { %528 = vmatpush3.msra.mxu0 %v267_v1  ;;  %s509_s21 = sshll.u32 %s756_s16, 3  ;;  %v261_v8 = vld [vmem:[%s830_s1 + $0x8] sm:$0xff]  ;;  %v260_v9 = vld [vmem:[%s830_s1] sm:$0xff]  ;;  %588 = vset.pattern.permute.xlu0 %v657_v19  ;;  %vm370_vm3 = vcmask 7168   ;;  %s244_s16 = scalar_lea.vmem [#allocation3], %s243_s29  ;;  %vm403_vm4 = vcmask 516096  }
  0x19   : > { %529 = vmatprep.subr.mxu0 %v655_v2  ;;  %s254_s12 = scalar_lea.vmem %s829_s0, %s509_s21  ;;  %v511_v11 = vld [vmem:[%s831_s2] ss:$0 sm:$0xff]  ;;  %s258_s27 = scalar_lea.vmem %s835_s6, %s509_s21 }
  0x1a   : > { %530 = vmatpush3.msra.mxu0 %v266_v3  ;;  %v259_v10 = vld [vmem:[%s254_s12] sm:$0xff]  ;;  %s423_s10 = sshll.u32 %s244_s16, 4  ;;  %s421_s12 = scalar_lea.hbm %s834_s5, %s515_s30  ;;  %s424_s10 = int_to_ptr.vmem [resolvable:$true] %s423_s10 }
  0x1b   : > { %531 = vmatprep.subr.mxu0 %v655_v2  ;;  %v513_v15 = vld [vmem:[%s832_s3] ss:$0 sm:$0xff]  ;;  %s593_s14 = scalar_lea.vmem %s424_s10, 16  ;;  %s599_s4 = scalar_lea.vmem %s598_s17, 32 }
  0x1c   : > { %532 = vmatpush3.msra.mxu0 %v265_v4  ;;  %v514_v20 = vld [vmem:[#allocation2] ss:$0 sm:$0xff]  ;;  %p594_p11 = scmp.ne.s32.totalorder %s424_s10, %s593_s14  ;;  %p600_p0 = scmp.lt.s32.totalorder %s424_s10, %s598_s17 }
  0x1d   : > { %533 = vmatprep.subr.mxu0 %v655_v2  ;;  %p601_p1 = scmp.lt.s32.totalorder %s599_s4, %s593_s14 }
  0x1e   : > { %534 = vmatpush3.msra.mxu0 %v264_v5  ;;  %p595_p12 = pnand %p594_p11, %p735_p5 }
  0x1f   : > { %535 = vmatprep.subr.mxu0 %v655_v2  ;;  %p602_p2 = por %p601_p1, %p600_p0 }
  0x20   : > { %536 = vmatpush3.msra.mxu0 %v263_v6  ;;  %p596_p13 = pneg %p595_p12 }
  0x21   : > { %537 = vmatprep.subr.mxu0 %v655_v2 }
  0x22   : > { %538 = vmatpush3.msra.mxu0 %v262_v7  ;;  %p603_p3 = pnand %p602_p2, %p596_p13 }
  0x23   : > { %539 = vmatprep.subr.mxu0 %v655_v2 }
  0x24   : > { %540 = vmatpush3.msra.mxu0 %v261_v8 }
  0x25   : > { %541 = vmatprep.subr.mxu0 %v655_v2 }
  0x26   : > { %542 = vmatpush3.msra.mxu0 %v260_v9 }
  0x27   : > { %544 = vmatmul.mubr.msk.f32.vlgmr.msra.gmra.mxu0 %vm275_vm1, %v259_v10 }
  0xe7   : > { %v345_v12 = vpop.f32.mrf.mxu0 }
  0xe8   : > { %v346_v13 = vadd.f32 %v511_v11, %v345_v12 }
  0xe9   : > { %v545_v14 = vpop.f32.mrf.mxu0 }
  0xea   : > { %v349_v16 = vmax.f32 %v346_v13, 0.0 }
  0xec   : > { %v357_v17 = vmul.f32 %v513_v15, %v349_v16 }
  0xee   : > { %v359_v18 = vsel %vm358_vm2, %v357_v17, 0.0 }
  0xef   : > { %360 = vadd.xlane.f32.xlu0 %v359_v18 }
 0x178   : > { %v361_v21 = vpop.xlane.xlu0 %360 }
 0x179   : > { %v369_v22 = vadd.f32 %v514_v20, %v361_v21 }
 0x17b   : > { %v371_v23 = vsel %vm370_vm3, %v369_v22, -inf }
 0x17c   : > { %v372_v24 = vrot.slane %v371_v23, 4 }
 0x17e   : > { %v373_v25 = vmax.f32 %v371_v23, %v372_v24 }
 0x180   : > { %v374_v26 = vrot.slane %v373_v25, 2 }
 0x182   : > { %v375_v27 = vmax.f32 %v373_v25, %v374_v26 }
 0x184   : > { %v376_v28 = vrot.slane %v375_v27, 1 }
 0x186   : > { %v377_v29 = vmax.f32 %v375_v27, %v376_v28 }
 0x188   : > { %v378_v30 = vsub.f32 %v369_v22, %v377_v29 }
 0x18a   : > { %v379_v31 = vmul.f32 1.442695, %v378_v30 }
 0x18c   : > { %589 = vpow2.f32 %v379_v31 }
 0x199   : > { %v590_v32 = vpop.eup %589 }
 0x19a   : > { %v381_v33 = vsel %vm370_vm3, %v590_v32, 0.0 }
 0x19b   : > { %v382_v34 = vrot.slane %v381_v33, 4 }
 0x19d   : > { %v383_v35 = vadd.f32 %v382_v34, %v381_v33 }
 0x19f   : > { %v384_v36 = vrot.slane %v383_v35, 2 }
 0x1a1   : > { %v385_v37 = vadd.f32 %v384_v36, %v383_v35 }
 0x1a3   : > { %v386_v38 = vrot.slane %v385_v37, 1 }
 0x1a5   : > { %v387_v39 = vadd.f32 %v386_v38, %v385_v37 }
 0x1a7   : > { %591 = vrcp.f32 %v387_v39 }
 0x1b4   : > { %v592_v40 = vpop.eup %591 }
 0x1b5   : > { %v389_v41 = vmul.f32 %v592_v40, %v590_v32 }
 0x1b7   : > { %392 = vperm.xlu0 %588, %v389_v41   ;;  %405 = vst.msk [vmem:[%s258_s27] sm:$0xff] %vm370_vm3, %v389_v41 }
 0x232   : > { %v393_v42 = vpop.permute.xlu0 %392 }
 0x233   : > { %v395_v43 = vmul.f32 %v393_v42, %v259_v10 }
 0x235   : > { %v396_v44 = vsel %vm275_vm1, %v395_v43, 0.0 }
 0x236   : > { %v397_v45 = vrot.slane %v396_v44, 4 }
 0x238   : > { %v398_v46 = vadd.f32 %v397_v45, %v396_v44 }
 0x23a   : > { %v399_v47 = vrot.slane %v398_v46, 2 }
 0x23c   : > { %v400_v48 = vadd.f32 %v399_v47, %v398_v46 }
 0x23e   : > { %v401_v49 = vrot.slane %v400_v48, 1 }
 0x240   : > { %v402_v50 = vadd.f32 %v401_v49, %v400_v48 }
 0x242   : > { %404 = vst.msk [vmem:[%s244_s16] sm:$0x1] %vm403_vm4, %v402_v50 }
 0x243   : > { %606 = shalt.err (!%p603_p3)
}
 0x244   : > { %s607_s18 = scalar_lea.hbm %s421_s12, 16  ;;  %s611_s22 = scalar_lea.hbm %s834_s5, 32 }
 0x245   : > { %p608_p4 = scmp.ne.s32.totalorder %s421_s12, %s607_s18  ;;  %p612_p9 = scmp.lt.s32.totalorder %s421_s12, %s834_s5 }
 0x246   : > { %p613_p10 = scmp.lt.s32.totalorder %s611_s22, %s607_s18 }
 0x247   : > { %p609_p7 = pnand %p608_p4, %p735_p5 }
 0x248   : > { %p614_p11 = por %p613_p10, %p612_p9 }
 0x249   : > { %p610_p8 = pneg %p609_p7 }
 0x24b   : > { %p615_p12 = pnand %p614_p11, %p610_p8 }
 0x24d   : > { %618 = shalt.err (!%p615_p12)
}
 0x24e   : > { %546 = dma.vmem_to_hbm [thread:$0]  (%p735_p5), %s424_s10, 16, %s421_s12, %s407_s13  }
 0x24f PF: > { %p552_p13 = scmp.ge.s32.totalorder %s653_s26, 2  ;;  %s438_s30 = sand.u32 1, %s641_s23  }
 0x250   : > { %s439_s16 = scalar_lea.sflag [#allocation4], %s438_s30 }
 0x251   : > { %p549_p0 = pnand %p552_p13, %p739_p6 }
 0x253   : > { %p550_p1 = pneg %p549_p0 }
 0x255   : > { %636 = dma.done.wait (%p550_p1), %s439_s16, 16  }
 0x256   : > { %638 = vsyncadd (%p550_p1), %s439_s16, 4294967280  ;;  %p19_p2 = scmp.ge.s32.totalorder %s722_s28, 4   ;;  %s838_s23 = smov %s645_s24 }
 0x257   : > { %s839_s24 = smov %s649_s25  ;;  %s840_s25 = smov %s733_s7 }
 0x258   : > { %s841_s26 = smov %s722_s28  ;;  %21 = sbr.rel (!%p19_p2) target bundleno = 6 (0x6), region = 87 }
 0x25d   :  { %450 = vsyncpa [#allocation4], 1 }
 0x25e   :  { %452 = vsyncpa [#allocation4 + $0x1], 1 }

</bundles_post_ra>
